<compile_context>
chip_gen: v7x
topology: tpu7x:2x2x1
jax: 0.10.0
libtpu: 0.0.40
codegen_flags: <defaults>
</compile_context>

<pallas_src>
import math
import functools

import jax
import jax.numpy as jnp
from jax.experimental import pallas as pl
from jax.experimental.pallas import tpu as pltpu

D_MODEL = 32
LANES = 128                 # TPU lane width
MAX_ROW_TILE = 2048         # packed rows per grid step (=> up to 1 MiB f32 output block)
MIN_SPLIT_ROWS = 1024       # at/above this many rows: use an even number (>=2) of grid steps
MIN_PALLAS_ELEMS = 8192     # below this, plain jnp beats kernel-launch overhead


def _round_up(x, m):
    return ((x + m - 1) // m) * m


def _cdiv(a, b):
    return -(-a // b)


def _freq_phase(d_model):
    """Per-column frequency/phase so that sin(pos*freq + phase) == PE row."""
    half = jnp.exp(jnp.arange(0, d_model, 2, dtype=jnp.float32)
                   * (-math.log(10000.0) / d_model))            # (d_model//2,)
    freq_col = jnp.repeat(half, 2)                               # freq[j] = half[j//2]
    phase_col = jnp.tile(jnp.array([0.0, math.pi / 2], jnp.float32), d_model // 2)
    return freq_col, phase_col


def _posenc_kernel(idx_ref, sel_ref, freq_ref, phase_ref, o_ref):
    # idx_ref:   (T, PACK)   int32  packed index values
    # sel_ref:   (PACK, 128) f32    one-hot lane-group selector
    # freq_ref:  (1, 128)    f32    per-lane frequency
    # phase_ref: (1, 128)    f32    0 / pi/2 per lane (sin vs cos columns)
    # o_ref:     (T, 128)    f32    lane-dense PE slab
    pos = jnp.dot(idx_ref[...].astype(jnp.float32), sel_ref[...],
                  preferred_element_type=jnp.float32,
                  precision=jax.lax.Precision.HIGHEST)   # (T,128): idx broadcast per 32-lane group
    o_ref[...] = jnp.sin(pos * freq_ref[...] + phase_ref[...])


@functools.partial(jax.jit, static_argnames=("d_model", "small_fallback"))
def pos_enc_index(x, d_model: int = D_MODEL, small_fallback: bool = True):
    """JAX/Pallas equivalent of PosEncIndex.forward(x)."""
    orig_shape = x.shape
    flat = x.reshape(-1).astype(jnp.int32)
    n = flat.shape[0]
    freq_col, phase_col = _freq_phase(d_model)

    pack_ok = (LANES % d_model) == 0
    if (not pack_ok) or (small_fallback and n < MIN_PALLAS_ELEMS):
        # Tiny inputs (or d_model that does not pack into 128 lanes): a fused
        # jnp expression beats the kernel-launch + reshape round trip.
        out = jnp.sin(flat.astype(jnp.float32)[:, None] * freq_col[None, :]
                      + phase_col[None, :])
        return out.reshape(*orig_shape, d_model)

    pack = LANES // d_model
    rows = _cdiv(n, pack)

    if rows < MIN_SPLIT_ROWS:
        # Single block equal to the full array dims (legal regardless of the
        # (8,128) divisibility rule); no row padding in this case.
        num_steps = 1
        row_tile = rows
    else:
        # Even number of grid steps (v7x megacore sharding), <= 2048 rows each.
        num_steps = 2 * _cdiv(rows, 2 * MAX_ROW_TILE)
        row_tile = _round_up(_cdiv(rows, num_steps), 8)
    rows_pad = row_tile * num_steps

    pad_elems = rows_pad * pack - n
    if pad_elems:
        flat = jnp.pad(flat, (0, pad_elems))
    idx_packed = flat.reshape(rows_pad, pack)

    freq_lane = jnp.tile(freq_col, pack)[None, :]          # (1, 128)
    phase_lane = jnp.tile(phase_col, pack)[None, :]        # (1, 128)
    sel = (jnp.arange(LANES) // d_model == jnp.arange(pack)[:, None]
           ).astype(jnp.float32)                           # (pack, 128) one-hot

    out = pl.pallas_call(
        _posenc_kernel,
        out_shape=jax.ShapeDtypeStruct((rows_pad, LANES), jnp.float32),
        grid_spec=pltpu.PrefetchScalarGridSpec(
            num_scalar_prefetch=0,
            grid=(num_steps,),
            in_specs=[
                pl.BlockSpec((row_tile, pack), lambda i: (i, 0)),
                pl.BlockSpec((pack, LANES), lambda i: (0, 0)),
                pl.BlockSpec((1, LANES), lambda i: (0, 0)),
                pl.BlockSpec((1, LANES), lambda i: (0, 0)),
            ],
            out_specs=pl.BlockSpec((row_tile, LANES), lambda i: (i, 0)),
        ),
        compiler_params=pltpu.CompilerParams(
            dimension_semantics=("parallel",)),
    )(idx_packed, sel, freq_lane, phase_lane)

    # Row-major (rows_pad, 128) == (rows_pad*pack, d_model): unpack is a reshape.
    out_flat = out.reshape(-1, d_model)
    if pad_elems:
        # Only materialize a prefix slice when padding actually exists.
        out_flat = out_flat[:n]
    return out_flat.reshape(*orig_shape, d_model)


def _reference(x, d_model: int = D_MODEL):
    # Pure-JAX mirror of the PyTorch module (table build + gather).
    length = int(jnp.max(x)) + 1
    position = jnp.arange(length, dtype=jnp.float32)[:, None]
    div_term = jnp.exp(jnp.arange(0, d_model, 2, dtype=jnp.float32)
                       * (-math.log(10000.0) / d_model))
    pe = jnp.zeros((length, d_model), jnp.float32)
    pe = pe.at[:, 0::2].set(jnp.sin(position * div_term))
    pe = pe.at[:, 1::2].set(jnp.cos(position * div_term))
    return pe[x]


if __name__ == "__main__":
    key = jax.random.PRNGKey(0)
    k1, k2, k3 = jax.random.split(key, 3)

    # Small shape matching the module's typical usage: (batch=2, seq=8).
    x_small = jax.random.randint(k1, (2, 8), minval=0, maxval=50, dtype=jnp.int32)
    # Force the Pallas path even at this tiny size so the kernel itself runs.
    out_small = jax.block_until_ready(pos_enc_index(x_small, small_fallback=False))
    ref_small = _reference(x_small)
    assert out_small.shape == (2, 8, D_MODEL), out_small.shape
    assert out_small.dtype == jnp.float32
    assert jnp.allclose(out_small, ref_small, atol=1e-4, rtol=1e-5)

    # Default wrapper (jnp fast path for tiny inputs) must agree too.
    out_fast = jax.block_until_ready(pos_enc_index(x_small))
    assert jnp.allclose(out_fast, ref_small, atol=1e-4, rtol=1e-5)

    # Shape that does not divide the pack width: exercises pad + trailing slice.
    x_pad = jax.random.randint(k2, (3, 7), minval=0, maxval=50, dtype=jnp.int32)
    out_pad = jax.block_until_ready(pos_enc_index(x_pad, small_fallback=False))
    assert out_pad.shape == (3, 7, D_MODEL), out_pad.shape
    assert jnp.allclose(out_pad, _reference(x_pad), atol=1e-4, rtol=1e-5)

    # Larger input: 16384 indices -> rows=4096 -> 2-step parallel grid with
    # 2048x128 (1 MiB) lane-dense output blocks and no padding / no slice.
    x_big = jax.random.randint(k3, (8, 2048), minval=0, maxval=50, dtype=jnp.int32)
    out_big = jax.block_until_ready(pos_enc_index(x_big))
    ref_big = _reference(x_big)
    assert out_big.shape == (8, 2048, D_MODEL), out_big.shape
    assert jnp.allclose(out_big, ref_big, atol=1e-4, rtol=1e-5)

    print("KERNEL_OK")
</pallas_src>

<mosaic_0001>
module attributes {stable_mosaic.version = 11 : i64} {
  func.func @_posenc_kernel(%arg0: i32, %arg1: memref<4x4xi32, #tpu.memory_space<vmem>>, %arg2: memref<4x128xf32, #tpu.memory_space<vmem>>, %arg3: memref<1x128xf32, #tpu.memory_space<vmem>>, %arg4: memref<1x128xf32, #tpu.memory_space<vmem>>, %arg5: memref<4x128xf32, #tpu.memory_space<vmem>>) attributes {dimension_semantics = [#tpu.dimension_semantics<parallel>], iteration_bounds = array<i64: 1>, scalar_prefetch = 0 : i64, scratch_operands = 0 : i64, tpu.core_type = #tpu.core_type<tc>, window_params = [{transform_indices = @transform_0, window_bounds = array<i64: 4, 4>}, {pipeline_mode = #tpu.pipeline_mode<synchronous>, transform_indices = @transform_1, window_bounds = array<i64: 4, 128>}, {pipeline_mode = #tpu.pipeline_mode<synchronous>, transform_indices = @transform_2, window_bounds = array<i64: 1, 128>}, {pipeline_mode = #tpu.pipeline_mode<synchronous>, transform_indices = @transform_3, window_bounds = array<i64: 1, 128>}, {transform_indices = @transform_4, window_bounds = array<i64: 4, 128>}]} {
    %c0 = arith.constant 0 : index
    %c0_0 = arith.constant 0 : index
    %0 = vector.load %arg1[%c0, %c0_0] : memref<4x4xi32, #tpu.memory_space<vmem>>, vector<4x4xi32>
    %1 = arith.sitofp %0 : vector<4x4xi32> to vector<4x4xf32>
    %c0_1 = arith.constant 0 : index
    %c0_2 = arith.constant 0 : index
    %2 = vector.load %arg2[%c0_1, %c0_2] : memref<4x128xf32, #tpu.memory_space<vmem>>, vector<4x128xf32>
    %cst = arith.constant dense<0.000000e+00> : vector<4x128xf32>
    %3 = tpu.matmul %1, %2, %cst {dimension_numbers = #tpu.dot_dimension_numbers<[1], [0], [0], [1], [0, 0, 1, 1], [], []>, precision = #tpu.contract_precision<fp32>} : vector<4x4xf32>, vector<4x128xf32>, vector<4x128xf32> -> vector<4x128xf32>
    %c0_3 = arith.constant 0 : index
    %c0_4 = arith.constant 0 : index
    %4 = vector.load %arg3[%c0_3, %c0_4] : memref<1x128xf32, #tpu.memory_space<vmem>>, vector<1x128xf32>
    %5 = vector.broadcast %4 : vector<1x128xf32> to vector<4x128xf32>
    %6 = arith.mulf %3, %5 : vector<4x128xf32>
    %c0_5 = arith.constant 0 : index
    %c0_6 = arith.constant 0 : index
    %7 = vector.load %arg4[%c0_5, %c0_6] : memref<1x128xf32, #tpu.memory_space<vmem>>, vector<1x128xf32>
    %8 = vector.broadcast %7 : vector<1x128xf32> to vector<4x128xf32>
    %9 = arith.addf %6, %8 : vector<4x128xf32>
    %10 = math.sin %9 : vector<4x128xf32>
    %c0_7 = arith.constant 0 : index
    %c0_8 = arith.constant 0 : index
    %11 = vector.load %arg5[%c0_7, %c0_8] : memref<4x128xf32, #tpu.memory_space<vmem>>, vector<4x128xf32>
    tpu.vector_store %arg5[%c0_7, %c0_8], %10 {strides = array<i32>} : memref<4x128xf32, #tpu.memory_space<vmem>>, vector<4x128xf32>,
    return
  }
  func.func @transform_0(%arg0: i32) -> (i32, i32) {
    %c0_i32 = arith.constant 0 : i32
    %c0_i32_0 = arith.constant 0 : i32
    return %arg0, %c0_i32 : i32, i32
  }
  func.func @transform_1(%arg0: i32) -> (i32, i32) {
    %c0_i32 = arith.constant 0 : i32
    %c0_i32_0 = arith.constant 0 : i32
    %c0_i32_1 = arith.constant 0 : i32
    return %c0_i32, %c0_i32_0 : i32, i32
  }
  func.func @transform_2(%arg0: i32) -> (i32, i32) {
    %c0_i32 = arith.constant 0 : i32
    %c0_i32_0 = arith.constant 0 : i32
    %c0_i32_1 = arith.constant 0 : i32
    return %c0_i32, %c0_i32_0 : i32, i32
  }
  func.func @transform_3(%arg0: i32) -> (i32, i32) {
    %c0_i32 = arith.constant 0 : i32
    %c0_i32_0 = arith.constant 0 : i32
    %c0_i32_1 = arith.constant 0 : i32
    return %c0_i32, %c0_i32_0 : i32, i32
  }
  func.func @transform_4(%arg0: i32) -> (i32, i32) {
    %c0_i32 = arith.constant 0 : i32
    %c0_i32_0 = arith.constant 0 : i32
    return %arg0, %c0_i32 : i32, i32
  }
}

</mosaic_0001>

<bundles_post_ra>
// kernel: tile.17
= control target key start
LH: loop header
LB: loop body
LE: loop exit
PB: predicated region body
PF: predicated region fallthrough
CT: control target
= control target key end

     0   :  { %s22_s0 = inlined_call_operand.vmem [shape: f32[32], index: 0, kind: input, shape index: {}]   ;;  %s23_s1 = inlined_call_operand.vmem [shape: f32[4,32], index: 1, kind: output, shape index: {}]  }
   0x1   :  { %v4_v0 = vld [vmem:[%s22_s0] ss:$0 sm:$0xff] }
   0x2   :  { %5 = vst [vmem:[%s23_s1] sm:$0xf] %v4_v0 }

// kernel: tile.16
= control target key start
LH: loop header
LB: loop body
LE: loop exit
PB: predicated region body
PF: predicated region fallthrough
CT: control target
= control target key end

     0   :  { %s131_s10 = smov 30   ;;  %s132_s11 = smov 26   ;;  %vm3_vm0 = vcmask 15360   ;;  %vm9_vm1 = vcmask 261360   ;;  %vm15_vm2 = vcmask 244960   ;;  %vm21_vm3 = vcmask 228560   ;;  %s207_s0 = inlined_call_operand.vmem [shape: f32[16,2], index: 0, kind: input, shape index: {}]   ;;  %s208_s1 = inlined_call_operand.vmem [shape: f32[32], index: 1, kind: output, shape index: {}]  }
   0x1   :  { %v101_v0 = vld [vmem:[%s207_s0 + $0xf] sm:$0x1]   ;;  %v103_v1 = vld [vmem:[%s207_s0 + $0xd] sm:$0x1]   ;;  %v102_v2 = vld [vmem:[%s207_s0 + $0xe] sm:$0x1]  }
   0x2   :  { %7 = vrot.lane.b32.xlu0 %v101_v0, %s131_s10  ;;  %19 = vrot.lane.b32.xlu1 %v103_v1, %s132_s11  ;;  %v104_v3 = vld [vmem:[%s207_s0 + $0xc] sm:$0x1]   ;;  %s133_s16 = smov 28   ;;  %s134_s17 = smov 24   ;;  %v105_v4 = vld [vmem:[%s207_s0 + $0xb] sm:$0x1]  }
   0x3   :  { %v106_v5 = vld [vmem:[%s207_s0 + $0xa] sm:$0x1]   ;;  %v2_v6 = vld [vmem:[%s207_s0] sm:$0x1]   ;;  %s135_s24 = smov 22   ;;  %s136_s25 = smov 20  }
   0x4   :  { %4 = vst.msk [vmem:[#allocation0] sm:$0x1] %vm3_vm0, %v2_v6   ;;  %v107_v7 = vld [vmem:[%s207_s0 + $0x9] sm:$0x1]   ;;  %v108_v8 = vld [vmem:[%s207_s0 + $0x8] sm:$0x1]  }
   0x5   :  { %s137_s30 = smov 18   ;;  %s138_s2 = smov 16   ;;  %v109_v9 = vld [vmem:[%s207_s0 + $0x7] sm:$0x1]   ;;  %v110_v10 = vld [vmem:[%s207_s0 + $0x6] sm:$0x1]  }
   0x6   :  { %13 = vrot.lane.b32.xlu0 %v102_v2, %s133_s16  ;;  %25 = vrot.lane.b32.xlu1 %v104_v3, %s134_s17  ;;  %s139_s7 = smov 14   ;;  %s140_s8 = smov 12   ;;  %v111_v11 = vld [vmem:[%s207_s0 + $0x5] sm:$0x1]   ;;  %v112_v12 = vld [vmem:[%s207_s0 + $0x4] sm:$0x1]  }
   0x7   :  { %s141_s13 = smov 10   ;;  %s142_s14 = smov 8   ;;  %v113_v13 = vld [vmem:[%s207_s0 + $0x3] sm:$0x1]   ;;  %v114_v14 = vld [vmem:[%s207_s0 + $0x2] sm:$0x1]  }
   0x8   :  { %s143_s19 = smov 6   ;;  %s144_s20 = smov 4   ;;  %v115_v15 = vld [vmem:[%s207_s0 + $0x1] sm:$0x1]   ;;  %vm27_vm4 = vcmask 212160   ;;  %vm33_vm5 = vcmask 195760  }
   0x9   :  { %s145_s0 = smov 2   ;;  %vm39_vm6 = vcmask 179360   ;;  %vm45_vm7 = vcmask 162960   ;;  %vm51_vm8 = vcmask 146560   ;;  %vm57_vm9 = vcmask 130160  }
   0xa   :  { %31 = vrot.lane.b32.xlu0 %v105_v4, %s135_s24  ;;  %37 = vrot.lane.b32.xlu1 %v106_v5, %s136_s25  ;;  %vm63_vm10 = vcmask 113760   ;;  %vm69_vm11 = vcmask 97360   ;;  %vm75_vm12 = vcmask 80960   ;;  %vm81_vm13 = vcmask 64560  }
   0xb   :  { %vm87_vm14 = vcmask 48160   ;;  %vm93_vm15 = vcmask 31760  }
   0xe   :  { %43 = vrot.lane.b32.xlu0 %v107_v7, %s137_s30  ;;  %49 = vrot.lane.b32.xlu1 %v108_v8, %s138_s2 }
  0x12   :  { %55 = vrot.lane.b32.xlu0 %v109_v9, %s139_s7  ;;  %61 = vrot.lane.b32.xlu1 %v110_v10, %s140_s8 }
  0x16   :  { %67 = vrot.lane.b32.xlu0 %v111_v11, %s141_s13  ;;  %73 = vrot.lane.b32.xlu1 %v112_v12, %s142_s14 }
  0x1a   :  { %79 = vrot.lane.b32.xlu0 %v113_v13, %s143_s19  ;;  %85 = vrot.lane.b32.xlu1 %v114_v14, %s144_s20 }
  0x1e   :  { %91 = vrot.lane.b32.xlu0 %v115_v15, %s145_s0 }
  0x74   :  { %v8_v16 = vpop.permute.xlu0 %7   ;;  %v20_v17 = vpop.permute.xlu1 %19  }
  0x75   :  { %10 = vst.msk [vmem:[#allocation0] sm:$0x1] %vm9_vm1, %v8_v16  }
  0x78   :  { %v14_v18 = vpop.permute.xlu0 %13   ;;  %v26_v19 = vpop.permute.xlu1 %25  }
  0x79   :  { %16 = vst.msk [vmem:[#allocation0] sm:$0x1] %vm15_vm2, %v14_v18  }
  0x7a   :  { %22 = vst.msk [vmem:[#allocation0] sm:$0x1] %vm21_vm3, %v20_v17  }
  0x7b   :  { %28 = vst.msk [vmem:[#allocation0] sm:$0x1] %vm27_vm4, %v26_v19  }
  0x7c   :  { %v32_v20 = vpop.permute.xlu0 %31   ;;  %v38_v21 = vpop.permute.xlu1 %37  }
  0x7d   :  { %34 = vst.msk [vmem:[#allocation0] sm:$0x1] %vm33_vm5, %v32_v20  }
  0x7e   :  { %40 = vst.msk [vmem:[#allocation0] sm:$0x1] %vm39_vm6, %v38_v21  }
  0x80   :  { %v44_v22 = vpop.permute.xlu0 %43   ;;  %v50_v23 = vpop.permute.xlu1 %49  }
  0x81   :  { %46 = vst.msk [vmem:[#allocation0] sm:$0x1] %vm45_vm7, %v44_v22  }
  0x82   :  { %52 = vst.msk [vmem:[#allocation0] sm:$0x1] %vm51_vm8, %v50_v23  }
  0x84   :  { %v56_v24 = vpop.permute.xlu0 %55   ;;  %v62_v25 = vpop.permute.xlu1 %61  }
  0x85   :  { %58 = vst.msk [vmem:[#allocation0] sm:$0x1] %vm57_vm9, %v56_v24  }
  0x86   :  { %64 = vst.msk [vmem:[#allocation0] sm:$0x1] %vm63_vm10, %v62_v25  }
  0x88   :  { %v68_v26 = vpop.permute.xlu0 %67   ;;  %v74_v27 = vpop.permute.xlu1 %73  }
  0x89   :  { %70 = vst.msk [vmem:[#allocation0] sm:$0x1] %vm69_vm11, %v68_v26  }
  0x8a   :  { %76 = vst.msk [vmem:[#allocation0] sm:$0x1] %vm75_vm12, %v74_v27  }
  0x8c   :  { %v80_v28 = vpop.permute.xlu0 %79   ;;  %v86_v29 = vpop.permute.xlu1 %85  }
  0x8d   :  { %82 = vst.msk [vmem:[#allocation0] sm:$0x1] %vm81_vm13, %v80_v28  }
  0x8e   :  { %88 = vst.msk [vmem:[#allocation0] sm:$0x1] %vm87_vm14, %v86_v29  }
  0x90   :  { %v92_v30 = vpop.permute.xlu0 %91  }
  0x91   :  { %94 = vst.msk [vmem:[#allocation0] sm:$0x1] %vm93_vm15, %v92_v30  }
  0x98   :  { %v98_v31 = vld [vmem:[#allocation0] sm:$0x1] }
  0x99   :  { %100 = vst [vmem:[%s208_s1] sm:$0x1] %v98_v31 }

// kernel: tile.18
= control target key start
LH: loop header
LB: loop body
LE: loop exit
PB: predicated region body
PF: predicated region fallthrough
CT: control target
= control target key end

     0   :  { %vm7_vm0 = vcmask 261120   ;;  %s37_s8 = smov 32   ;;  %s38_s9 = smov 64   ;;  %vm13_vm1 = vcmask 1048320   ;;  %vm19_vm2 = vcmask 785920   ;;  %vm25_vm3 = vcmask 523520   ;;  %s55_s0 = inlined_call_operand.vmem [shape: f32[4,32], index: 0, kind: input, shape index: {}]   ;;  %s56_s1 = inlined_call_operand.vmem [shape: f32[1,128], index: 1, kind: output, shape index: {}]  }
   0x1   :  { %v4_v0 = vld [vmem:[%s55_s0] sm:$0xf]  ;;  %s36_s0 = smov 96  }
   0x2   :  { %5 = vst [vmem:[#allocation1] sm:$0xf] %v4_v0 }
   0x9   :  { %v10_v1 = vld [vmem:[#allocation1 + $0x3] sm:$0x1]   ;;  %v22_v2 = vld [vmem:[#allocation1 + $0x1] sm:$0x1]   ;;  %v6_v3 = vld [vmem:[#allocation1] sm:$0x1]  }
   0xa   :  { %11 = vrot.lane.b32.xlu0 %v10_v1, %s36_s0  ;;  %23 = vrot.lane.b32.xlu1 %v22_v2, %s37_s8  ;;  %v16_v4 = vld [vmem:[#allocation1 + $0x2] sm:$0x1]   ;;  %8 = vst.msk [vmem:[#allocation0] sm:$0x1] %vm7_vm0, %v6_v3  }
   0xe   :  { %17 = vrot.lane.b32.xlu0 %v16_v4, %s38_s9 }
  0x7c   :  { %v12_v5 = vpop.permute.xlu0 %11   ;;  %v24_v6 = vpop.permute.xlu1 %23  }
  0x7d   :  { %14 = vst.msk [vmem:[#allocation0] sm:$0x1] %vm13_vm1, %v12_v5  }
  0x80   :  { %v18_v7 = vpop.permute.xlu0 %17  }
  0x81   :  { %20 = vst.msk [vmem:[#allocation0] sm:$0x1] %vm19_vm2, %v18_v7  }
  0x82   :  { %26 = vst.msk [vmem:[#allocation0] sm:$0x1] %vm25_vm3, %v24_v6  }
  0x89   :  { %v30_v8 = vld [vmem:[#allocation0] sm:$0x1] }
  0x8a   :  { %32 = vst [vmem:[%s56_s1] sm:$0x1] %v30_v8 }

// kernel: tile.14
= control target key start
LH: loop header
LB: loop body
LE: loop exit
PB: predicated region body
PF: predicated region fallthrough
CT: control target
= control target key end

     0   :  { %s28_s0 = inlined_call_operand.vmem [shape: f32[2], index: 0, kind: input, shape index: {}]   ;;  %s29_s1 = inlined_call_operand.vmem [shape: f32[16,2], index: 1, kind: output, shape index: {}]  }
   0x1   :  { %v4_v0 = vld [vmem:[%s28_s0] ss:$0 sm:$0xff] }
   0x2   :  { %5 = vst [vmem:[%s29_s1] sm:$0xff] %v4_v0  ;;  %8 = vst [vmem:[%s29_s1 + $0x8] sm:$0xff] %v4_v0 }

// kernel: pos_enc_index.1
= control target key start
LH: loop header
LB: loop body
LE: loop exit
PB: predicated region body
PF: predicated region fallthrough
CT: control target
= control target key end

     0   :  { %vm24_vm0 = vcmask 1043456   ;;  %v672_v0 = vmov 0.0   ;;  %vm673_vm1 = vmmov 0   ;;  %vm20_vm2 = vcmask 31744   ;;  %s747_s1 = inlined_call_operand.vmem [shape: f32[4,128], index: 1, kind: input, shape index: {}]   ;;  %s748_s0 = inlined_call_operand.vmem [shape: s32[4,4], index: 0, kind: input, shape index: {}]   ;;  %s749_s2 = inlined_call_operand.vmem [shape: f32[1,128], index: 2, kind: input, shape index: {}]   ;;  %s750_s3 = inlined_call_operand.vmem [shape: f32[1,128], index: 3, kind: input, shape index: {}]   ;;  %s751_s4 = inlined_call_operand.vmem [shape: f32[4,128], index: 4, kind: output, shape index: {}]  }
   0x1   :  { %632 = vmatprep.subr.mxu0 %v672_v0  ;;  %v19_v1 = vld [vmem:[%s747_s1] sm:$0xf]  ;;  %634 = vmatprep.mubr.msk.f32.mxu0 %vm673_vm1, %v672_v0  ;;  %v674_v35 = vmov 683565275   ;;  %v675_v37 = vmov 2475754826  }
   0x2   :  { %v17_v2 = vld [vmem:[%s748_s0] sm:$0xf]  ;;  %v26_v3 = vsel %vm24_vm0, %v19_v1, 0  ;;  %617 = vmatprep.subr.mxu1 %v672_v0  ;;  %619 = vmatprep.mubr.msk.f32.mxu1 %vm673_vm1, %v672_v0  ;;  %v676_v40 = vmov 2131351028  }
   0x3   :  { %v18_v4 = vcvt.s32.f32 %v17_v2  ;;  %v29_v5 = vand.u32 4294901760, %v26_v3  ;;  %v599_v19 = vld [vmem:[%s749_s2] ss:$0 sm:$0xff]  ;;  %v677_v43 = vmov 2102212464  }
   0x4   :  { %v600_v22 = vld [vmem:[%s750_s3] ss:$0 sm:$0xff]  ;;  %v678_v46 = vmov 920167782   ;;  %v679_v49 = vmov 1326507024  }
   0x5   :  { %v22_v6 = vsel %vm20_vm2, %v18_v4, 0  ;;  %v106_v7 = vsub.f32 %v26_v3, %v29_v5  ;;  %633 = vmatpush3.msra.mxu0 %v29_v5  ;;  %618 = vmatpush3.msra.mxu1 %v29_v5 }
   0x6   :  { %v94_v8 = vand.u32 4294901760, %v22_v6  ;;  %622 = vmatprep.subr.mxu1 %v672_v0  ;;  %637 = vmatprep.subr.mxu0 %v672_v0 }
   0x7   :  { %v107_v10 = vand.u32 4294901760, %v106_v7 }
   0x8   :  { %v95_v9 = vsub.f32 %v22_v6, %v94_v8 }
   0x9   :  { %v108_v12 = vsub.f32 %v106_v7, %v107_v10 }
   0xa   :  { %v96_v11 = vand.u32 4294901760, %v95_v9 }
   0xb   :  { %v109_v14 = vand.u32 4294901760, %v108_v12 }
   0xc   :  { %635 = vmatmul.mubr.f32.vlgmr.msra.gmra.mrb[0].mxu0 %v96_v11  ;;  %v97_v13 = vsub.f32 %v95_v9, %v96_v11 }
   0xd   :  { %638 = vmatpush3.msra.mxu0 %v107_v10  ;;  %639 = vmatprep.mubr.msk.f32.mxu0 %vm673_vm1, %v672_v0 }
   0xe   :  { %v98_v15 = vand.u32 4294901760, %v97_v13  ;;  %642 = vmatprep.subr.mxu0 %v672_v0 }
  0x10   :  { %620 = vmatmul.mubr.f32.vlgmr.msra.gmra.mrb[0].mxu1 %v98_v15 }
  0x11   :  { %623 = vmatpush3.msra.mxu1 %v109_v14  ;;  %624 = vmatprep.mubr.msk.f32.mxu1 %vm673_vm1, %v672_v0 }
  0x12   :  { %627 = vmatprep.subr.mxu1 %v672_v0 }
  0x14   :  { %640 = vmatmul.mubr.f32.vlgmr.msra.gmra.mrb[0].mxu0 %v94_v8 }
  0x15   :  { %643 = vmatpush3.msra.mxu0 %v29_v5  ;;  %644 = vmatprep.mubr.msk.f32.mxu0 %vm673_vm1, %v672_v0 }
  0x18   :  { %625 = vmatmul.mubr.f32.vlgmr.msra.gmra.mrb[0].mxu1 %v94_v8 }
  0x19   :  { %628 = vmatpush3.msra.mxu1 %v106_v7  ;;  %629 = vmatprep.mubr.msk.f32.mxu1 %vm673_vm1, %v672_v0 }
  0x1c   :  { %645 = vmatmul.mubr.f32.vlgmr.msra.gmra.mrb[0].mxu0 %v94_v8 }
  0x20   :  { %630 = vmatmul.mubr.f32.vlgmr.msra.gmra.mrb[0].mxu1 %v95_v9 }
  0xef   :  { %v470_v16 = vpop.f32.mrb[0].mxu0 }
  0xf0   :  { %v646_v17 = vpop.f32.mrb[1].mxu0 }
  0xf3   :  { %v250_v18 = vpop.f32.mrb[0].mxu1 }
  0xf4   :  { %v647_v20 = vadd.f32 %v470_v16, %v250_v18  ;;  %v631_v21 = vpop.f32.mrb[1].mxu1 }
  0xf6   :  { %v481_v23 = vmul.f32 %v647_v20, %v599_v19 }
  0xf8   :  { %v723_v24 = vadd.f32 %v600_v22, %v481_v23 }
  0xfa   :  { %v493_v25 = vand.u32 2139095040, %v723_v24  ;;  %v490_v29 = vand.u32 2147483647, %v723_v24  ;;  %vm492_vm10 = vcmp.lt.s32.totalorder %v723_v24, 0  ;;  %vm582_vm15 = vweird.f32 %v723_v24 }
  0xfc   :  { %v494_v26 = vshrl.u32 %v493_v25, 23  ;;  %v497_v32 = vand.u32 8388607, %v490_v29  ;;  %vm491_vm11 = vcmp.le.f32.partialorder %v490_v29, 0.7853982 }
  0xfe   :  { %v601_v27 = vadd.s32 4294967169, %v494_v26  ;;  %v498_v51 = vor.u32 8388608, %v497_v32 }
 0x100   :  { %v500_v28 = vadd.s32 1, %v601_v27  ;;  %v538_v1 = vshll.u32 %v498_v51, 8 }
 0x102   :  { %vm501_vm3 = vcmp.gt.s32.totalorder %v500_v28, 0 }
 0x103   :  { %v502_v30 = vsel %vm501_vm3, %v500_v28, 0 }
 0x104   :  { %v504_v31 = vand.u32 31, %v502_v30  ;;  %v503_v34 = vshrl.u32 %v502_v30, 5 }
 0x106   :  { %v505_v33 = vsub.s32 32, %v504_v31  ;;  %v507_v36 = vshll.u32 %v674_v35, %v504_v31  ;;  %v510_v38 = vshll.u32 %v675_v37, %v504_v31  ;;  %v513_v42 = vshll.u32 %v676_v40, %v504_v31 }
 0x107   :  { %v516_v45 = vshll.u32 %v677_v43, %v504_v31  ;;  %v519_v48 = vshll.u32 %v678_v46, %v504_v31  ;;  %vm522_vm4 = vcmp.lt.s32.totalorder %v503_v34, 1  ;;  %vm525_vm5 = vcmp.lt.s32.totalorder %v503_v34, 4 }
 0x108   :  { %v508_v39 = vshrl.u32 %v675_v37, %v505_v33  ;;  %v511_v41 = vshrl.u32 %v676_v40, %v505_v33  ;;  %v514_v44 = vshrl.u32 %v677_v43, %v505_v33  ;;  %v517_v47 = vshrl.u32 %v678_v46, %v505_v33 }
 0x109   :  { %v520_v50 = vshrl.u32 %v679_v49, %v505_v33  ;;  %v506_v60 = vshrl.u32 %v674_v35, %v505_v33  ;;  %vm524_vm6 = vcmp.lt.s32.totalorder %v503_v34, 3  ;;  %vm523_vm7 = vcmp.lt.s32.totalorder %v503_v34, 2 }
 0x10a   :  { %v509_v52 = vor.u32 %v508_v39, %v507_v36  ;;  %v512_v53 = vor.u32 %v511_v41, %v510_v38  ;;  %v515_v54 = vor.u32 %v514_v44, %v513_v42  ;;  %v518_v55 = vor.u32 %v517_v47, %v516_v45 }
 0x10b   :  { %v521_v56 = vor.u32 %v520_v50, %v519_v48 }
 0x10c   :  { %v527_v57 = vsel %vm525_vm5, %v515_v54, 2102212464  ;;  %v530_v58 = vsel %vm522_vm4, %v509_v52, %v512_v53  ;;  %v534_v59 = vsel %vm522_vm4, %v512_v53, %v515_v54  ;;  %v531_v61 = vsel %vm525_vm5, %v518_v55, 920167782 }
 0x10d   :  { %v535_v62 = vsel %vm525_vm5, %v521_v56, 1326507024  ;;  %v532_v63 = vsel %vm524_vm6, %v515_v54, %v531_v61  ;;  %v526_v2 = vsel %vm522_vm4, %v506_v60, %v509_v52  ;;  %v528_v3 = vsel %vm524_vm6, %v512_v53, %v527_v57 }
 0x10e   :  { %v536_v0 = vsel %vm524_vm6, %v518_v55, %v535_v62  ;;  %v533_v4 = vsel %vm523_vm7, %v530_v58, %v532_v63  ;;  %v529_v10 = vsel %vm523_vm7, %v526_v2, %v528_v3 }
 0x10f   :  { %v537_v5 = vsel %vm523_vm7, %v534_v59, %v536_v0  ;;  %v732_v8 = vmul.u32.u64.low %v538_v1, %v533_v4  ;;  %v733_v9 = vmul.u32.u64.high %v538_v1, %v533_v4, %v732_v8  ;;  %v545_v12 = vmul.u32 %v538_v1, %v529_v10 }
 0x110   :  { %v729_v6 = vmul.u32.u64.low %v538_v1, %v537_v5  ;;  %v730_v7 = vmul.u32.u64.high %v538_v1, %v537_v5, %v729_v6 }
 0x111   :  { %v548_v11 = vadd.s32 1, %v733_v9 }
 0x112   :  { %vm547_vm8 = vc.u32 %v730_v7, %v732_v8  ;;  %v546_v25 = vadd.s32 %v732_v8, %v730_v7 }
 0x113   :  { %v549_v13 = vsel %vm547_vm8, %v548_v11, %v733_v9 }
 0x114   :  { %v550_v14 = vadd.s32 %v549_v13, %v545_v12 }
 0x116   :  { %v551_v15 = vadd.s32 536870912, %v550_v14 }
 0x118   :  { %v552_v16 = vshrl.u32 %v551_v15, 30 }
 0x11a   :  { %v553_v17 = vshll.u32 %v552_v16, 30  ;;  %v576_v38 = vsub.s32 4, %v552_v16 }
 0x11c   :  { %v554_v18 = vsub.s32 %v550_v14, %v553_v17  ;;  %v577_v41 = vsel %vm492_vm10, %v576_v38, %v552_v16 }
 0x11d   :  { %v579_v43 = vsel %vm491_vm11, 0, %v577_v41 }
 0x11e   :  { %v556_v19 = vsub.s32 0, %v554_v18  ;;  %v583_v44 = vadd.s32 3, %v579_v43 }
 0x120   :  { %v602_v20 = vmin.u32 %v556_v19, %v554_v18  ;;  %v584_v45 = vand.u32 3, %v583_v44 }
 0x122   :  { %v558_v21 = vclz %v602_v20  ;;  %vm589_vm12 = vcmp.eq.s32.totalorder %v584_v45, 2  ;;  %vm586_vm13 = vcmp.eq.s32.totalorder %v584_v45, 0  ;;  %vm585_vm14 = vcmp.lt.s32.totalorder %v584_v45, 2 }
 0x124   :  { %v603_v22 = vadd.s32 4294967294, %v558_v21 }
 0x126   :  { %vm604_vm9 = vcmp.lt.s32.totalorder %v603_v22, 0 }
 0x127   :  { %v561_v23 = vsel %vm604_vm9, 0, %v603_v22 }
 0x128   :  { %v562_v26 = vsub.s32 32, %v561_v23  ;;  %v566_v27 = vsub.s32 4294967266, %v561_v23  ;;  %v563_v28 = vshll.u32 %v554_v18, %v561_v23 }
 0x12a   :  { %v564_v30 = vshrl.u32 %v546_v25, %v562_v26  ;;  %v567_v31 = vadd.s32 127, %v566_v27 }
 0x12c   :  { %v565_v32 = vor.u32 %v564_v30, %v563_v28  ;;  %v568_v33 = vshll.u32 %v567_v31, 23 }
 0x12e   :  { %v569_v34 = vor.u32 4788187, %v568_v33  ;;  %v572_v36 = vcvt.s32.f32 %v565_v32 }
 0x130   :  { %v570_v35 = vand.u32 2147483647, %v569_v34 }
 0x132   :  { %v573_v37 = vmul.f32 %v572_v36, %v570_v35 }
 0x134   :  { %v574_v39 = vxor.u32 2147483648, %v573_v37 }
 0x136   :  { %v575_v40 = vsel %vm492_vm10, %v574_v39, %v573_v37 }
 0x137   :  { %v578_v42 = vsel %vm491_vm11, %v723_v24, %v575_v40 }
 0x138   :  { %668 = vcosq.f32 %v578_v42 }
 0x139   :  { %670 = vsinq.f32 %v578_v42 }
 0x142   :  { %v669_v46 = vpop.eup %668 }
 0x143   :  { %v671_v47 = vpop.eup %670  ;;  %v590_v48 = vxor.u32 2147483648, %v669_v46 }
 0x144   :  { %v587_v49 = vxor.u32 2147483648, %v671_v47 }
 0x145   :  { %v591_v50 = vsel %vm589_vm12, %v590_v48, %v671_v47 }
 0x146   :  { %v588_v51 = vsel %vm586_vm13, %v669_v46, %v587_v49 }
 0x147   :  { %v592_v29 = vsel %vm585_vm14, %v588_v51, %v591_v50 }
 0x148   :  { %v593_v52 = vsel %vm582_vm15, nan, %v592_v29 }
 0x149   :  { %594 = vst [vmem:[%s751_s4] sm:$0xf] %v593_v52 }

</bundles_post_ra>
